<compile_context>
chip_gen: v6e
topology: v6e:2x2x1
jax: 0.10.0
libtpu: 0.0.40
codegen_flags: <defaults>
</compile_context>

<pallas_src>
import functools
import math

import numpy as np
import jax
import jax.numpy as jnp
from jax.experimental import pallas as pl
from jax.experimental.pallas import tpu as pltpu


def _round_up(x: int, m: int) -> int:
    return ((x + m - 1) // m) * m


def _device_kind() -> str:
    try:
        return jax.devices()[0].device_kind.lower()
    except Exception:
        return ""


def _auto_silu_bf16() -> bool:
    # bf16 EUP/VPU paths exist on v6e/v7x; v5e (and older) gain nothing.
    kind = _device_kind()
    return ("v6" in kind) or ("v7" in kind)


def _has_two_tensorcores() -> bool:
    # v7x has 2 TensorCores per chip; keep >=2 parallel grid tiles there.
    return "v7" in _device_kind()


def _timestep_encoder_kernel(t_ref, vec_ref, w_ref, out_ref, *, silu_bf16):
    """One batch tile: (TILE_B,) timesteps -> (TILE_B, D) embeddings.

    t_ref   : (TILE_B, 1) f32   diffusion timesteps (column)
    vec_ref : (4, D)      f32   rows = [freqs (tiled twice), phase, b1, b2]
    w_ref   : (D, 2D)     bf16  [w1 | w2], each stored as (in, out) = W_pt.T
    out_ref : (TILE_B, D)
    """
    d = w_ref.shape[0]
    freq = vec_ref[0:1, :]
    phase = vec_ref[1:2, :]
    b1 = vec_ref[2:3, :]
    b2 = vec_ref[3:4, :]

    # Sinusoidal embedding with ONE full-width transcendental:
    #   emb[:, :half] = sin(t*f),  emb[:, half:] = cos(t*f) = sin(t*f + pi/2)
    angles = t_ref[...] * freq + phase                     # (TILE_B, D), f32
    emb = jnp.sin(angles)

    # Linear -> SiLU -> Linear; bf16 MXU operands, f32 accumulation.
    h = jnp.dot(emb.astype(jnp.bfloat16), w_ref[:, :d],
                preferred_element_type=jnp.float32) + b1
    if silu_bf16:
        hb = h.astype(jnp.bfloat16)
        act = hb * jax.nn.sigmoid(hb)                      # bf16 EUP/VPU path
    else:
        act = (h * jax.nn.sigmoid(h)).astype(jnp.bfloat16)  # f32 SiLU (v5e)
    y = jnp.dot(act, w_ref[:, d:],
                preferred_element_type=jnp.float32) + b2
    out_ref[...] = y.astype(out_ref.dtype)


def timestep_encoder(timesteps, w1, b1, w2, b2, *, max_period=10000,
                     tile_b=512, out_dtype=jnp.float32, silu_bf16=None):
    """timesteps: (B,).  w1/w2: (D, D) stored as (in, out) == W_pytorch.T.
    Returns (B, D) `out_dtype` time embeddings."""
    B = timesteps.shape[0]
    D = w1.shape[0]
    assert D % 2 == 0 and D >= 4, "embedding_dim must be even and >= 4"
    half = D // 2
    if silu_bf16 is None:
        silu_bf16 = _auto_silu_bf16()

    # Host-precomputed sinusoid constants; packed with the biases into one
    # (4, D) resident row block.
    coeff = math.log(max_period) / (half - 1)
    freqs_half = np.exp(-coeff * np.arange(half, dtype=np.float32))
    freqs_full = np.concatenate([freqs_half, freqs_half]).astype(np.float32)
    phase = np.concatenate([np.zeros((half,), np.float32),
                            np.full((half,), np.pi / 2, dtype=np.float32)])
    vec4 = jnp.stack([jnp.asarray(freqs_full), jnp.asarray(phase),
                      b1.astype(jnp.float32), b2.astype(jnp.float32)], axis=0)

    # Both weight matrices concatenated along the output axis -> one bf16 stream.
    w_cat = jnp.concatenate([w1, w2], axis=1).astype(jnp.bfloat16)   # (D, 2D)

    # Batch tiling: sublane-aligned tile, batch padded to a tile multiple.
    B8 = _round_up(B, 8)
    tb = max(8, min((int(tile_b) // 8) * 8, B8))
    if _has_two_tensorcores() and B >= 16:
        tb = min(tb, _round_up(-(-B8 // 2), 8))   # >= 2 parallel tiles on v7x
    Bp = _round_up(B, tb)
    n_tiles = Bp // tb

    t2d = jnp.pad(timesteps.astype(jnp.float32), (0, Bp - B)).reshape(Bp, 1)

    kernel = functools.partial(_timestep_encoder_kernel,
                               silu_bf16=bool(silu_bf16))

    out = pl.pallas_call(
        kernel,
        out_shape=jax.ShapeDtypeStruct((Bp, D), out_dtype),
        grid=(n_tiles,),
        in_specs=[
            pl.BlockSpec((tb, 1), lambda i: (i, 0)),     # timesteps (pipelined)
            pl.BlockSpec((4, D), lambda i: (0, 0)),      # freqs/phase/b1/b2 (resident)
            pl.BlockSpec((D, 2 * D), lambda i: (0, 0)),  # [w1 | w2] bf16    (resident)
        ],
        out_specs=pl.BlockSpec((tb, D), lambda i: (i, 0)),
        compiler_params=pltpu.CompilerParams(
            dimension_semantics=("parallel",)),          # shard batch tiles across TCs
    )(t2d, vec4, w_cat)
    # Avoid the extra HBM round trip of a slice when no padding was needed.
    return out if Bp == B else out[:B]


def _reference_f32(timesteps, w1, b1, w2, b2, max_period=10000):
    D = w1.shape[0]
    half = D // 2
    coeff = math.log(max_period) / (half - 1)
    freqs = jnp.exp(jnp.arange(half, dtype=jnp.float32) * -coeff)
    args = timesteps.astype(jnp.float32)[:, None] * freqs[None, :]
    emb = jnp.concatenate([jnp.sin(args), jnp.cos(args)], axis=-1)
    h = emb @ w1 + b1
    h = h * jax.nn.sigmoid(h)
    return h @ w2 + b2


def _reference_mixed(timesteps, w1, b1, w2, b2, max_period=10000,
                     silu_bf16=False):
    # Mirrors the kernel's numerics: bf16 matmul operands, f32 accumulation,
    # optional bf16 SiLU.
    D = w1.shape[0]
    half = D // 2
    coeff = math.log(max_period) / (half - 1)
    freqs = jnp.exp(jnp.arange(half, dtype=jnp.float32) * -coeff)
    args = timesteps.astype(jnp.float32)[:, None] * freqs[None, :]
    emb = jnp.concatenate([jnp.sin(args), jnp.cos(args)], axis=-1)
    h = jnp.dot(emb.astype(jnp.bfloat16), w1.astype(jnp.bfloat16),
                preferred_element_type=jnp.float32) + b1
    if silu_bf16:
        hb = h.astype(jnp.bfloat16)
        act = hb * jax.nn.sigmoid(hb)
    else:
        act = (h * jax.nn.sigmoid(h)).astype(jnp.bfloat16)
    return jnp.dot(act, w2.astype(jnp.bfloat16),
                   preferred_element_type=jnp.float32) + b2


if __name__ == "__main__":
    B = 8          # batch of diffusion timesteps
    D = 128        # embedding_dim

    key = jax.random.PRNGKey(0)
    k_t, k_w1, k_b1, k_w2, k_b2, k_t2 = jax.random.split(key, 6)

    # Deterministic synthetic parameters (Linear(D, D) x 2), stored as (in, out).
    scale = 1.0 / math.sqrt(D)
    w1 = jax.random.uniform(k_w1, (D, D), jnp.float32, -scale, scale)
    b1 = jax.random.uniform(k_b1, (D,), jnp.float32, -scale, scale)
    w2 = jax.random.uniform(k_w2, (D, D), jnp.float32, -scale, scale)
    b2 = jax.random.uniform(k_b2, (D,), jnp.float32, -scale, scale)

    # Diffusion timesteps (integer-valued, as in DDPM schedules).
    timesteps = jax.random.randint(k_t, (B,), 0, 1000).astype(jnp.float32)

    silu_bf16 = _auto_silu_bf16()

    out = jax.block_until_ready(timestep_encoder(timesteps, w1, b1, w2, b2))
    assert out.shape == (B, D)
    assert jnp.allclose(
        out, _reference_mixed(timesteps, w1, b1, w2, b2, silu_bf16=silu_bf16),
        atol=1e-2, rtol=1e-2), "mismatch vs mixed-precision reference"
    assert jnp.allclose(out, _reference_f32(timesteps, w1, b1, w2, b2),
                        atol=1e-1, rtol=1e-1), "mismatch vs f32 reference"

    # Exercise the multi-tile grid + batch-padding path.
    timesteps2 = jax.random.randint(k_t2, (200,), 0, 1000).astype(jnp.float32)
    out2 = jax.block_until_ready(
        timestep_encoder(timesteps2, w1, b1, w2, b2, tile_b=64))
    assert out2.shape == (200, D)
    assert jnp.allclose(
        out2, _reference_mixed(timesteps2, w1, b1, w2, b2, silu_bf16=silu_bf16),
        atol=1e-2, rtol=1e-2), "mismatch on multi-tile grid"

    print("KERNEL_OK")
</pallas_src>

<mosaic_0001>
module attributes {stable_mosaic.version = 11 : i64} {
  func.func @_timestep_encoder_kernel(%arg0: i32, %arg1: memref<8x1xf32, #tpu.memory_space<vmem>>, %arg2: memref<4x128xf32, #tpu.memory_space<vmem>>, %arg3: memref<128x256xbf16, #tpu.memory_space<vmem>>, %arg4: memref<8x128xf32, #tpu.memory_space<vmem>>) attributes {dimension_semantics = [#tpu.dimension_semantics<parallel>], iteration_bounds = array<i64: 1>, scalar_prefetch = 0 : i64, scratch_operands = 0 : i64, tpu.core_type = #tpu.core_type<tc>, window_params = [{transform_indices = @transform_0, window_bounds = array<i64: 8, 1>}, {pipeline_mode = #tpu.pipeline_mode<synchronous>, transform_indices = @transform_1, window_bounds = array<i64: 4, 128>}, {pipeline_mode = #tpu.pipeline_mode<synchronous>, transform_indices = @transform_2, window_bounds = array<i64: 128, 256>}, {transform_indices = @transform_3, window_bounds = array<i64: 8, 128>}]} {
    %c0 = arith.constant 0 : index
    %c0_0 = arith.constant 0 : index
    %0 = vector.load %arg2[%c0, %c0_0] : memref<4x128xf32, #tpu.memory_space<vmem>>, vector<1x128xf32>
    %c1 = arith.constant 1 : index
    %c0_1 = arith.constant 0 : index
    %1 = vector.load %arg2[%c1, %c0_1] : memref<4x128xf32, #tpu.memory_space<vmem>>, vector<1x128xf32>
    %c2 = arith.constant 2 : index
    %c0_2 = arith.constant 0 : index
    %2 = vector.load %arg2[%c2, %c0_2] : memref<4x128xf32, #tpu.memory_space<vmem>>, vector<1x128xf32>
    %c3 = arith.constant 3 : index
    %c0_3 = arith.constant 0 : index
    %3 = vector.load %arg2[%c3, %c0_3] : memref<4x128xf32, #tpu.memory_space<vmem>>, vector<1x128xf32>
    %c0_4 = arith.constant 0 : index
    %c0_5 = arith.constant 0 : index
    %4 = vector.load %arg1[%c0_4, %c0_5] : memref<8x1xf32, #tpu.memory_space<vmem>>, vector<8x1xf32>
    %5 = vector.broadcast %4 : vector<8x1xf32> to vector<8x128xf32>
    %6 = vector.broadcast %0 : vector<1x128xf32> to vector<8x128xf32>
    %7 = arith.mulf %5, %6 : vector<8x128xf32>
    %8 = vector.broadcast %1 : vector<1x128xf32> to vector<8x128xf32>
    %9 = arith.addf %7, %8 : vector<8x128xf32>
    %10 = math.sin %9 : vector<8x128xf32>
    %11 = arith.truncf %10 : vector<8x128xf32> to vector<8x128xbf16>
    %c0_6 = arith.constant 0 : index
    %c0_7 = arith.constant 0 : index
    %12 = vector.load %arg3[%c0_6, %c0_7] : memref<128x256xbf16, #tpu.memory_space<vmem>>, vector<128x128xbf16>
    %cst = arith.constant dense<0.000000e+00> : vector<8x128xf32>
    %13 = tpu.matmul %11, %12, %cst {dimension_numbers = #tpu.dot_dimension_numbers<[1], [0], [0], [1], [0, 0, 1, 1], [], []>} : vector<8x128xbf16>, vector<128x128xbf16>, vector<8x128xf32> -> vector<8x128xf32>
    %14 = vector.broadcast %2 : vector<1x128xf32> to vector<8x128xf32>
    %15 = arith.addf %13, %14 : vector<8x128xf32>
    %16 = arith.negf %15 : vector<8x128xf32>
    %17 = math.exp %16 : vector<8x128xf32>
    %cst_8 = arith.constant 1.000000e+00 : f32
    %18 = vector.broadcast %cst_8 : f32 to vector<8x128xf32>
    %19 = arith.addf %18, %17 : vector<8x128xf32>
    %20 = arith.divf %18, %19 : vector<8x128xf32>
    %21 = arith.mulf %15, %20 : vector<8x128xf32>
    %22 = arith.truncf %21 : vector<8x128xf32> to vector<8x128xbf16>
    %c0_9 = arith.constant 0 : index
    %c128 = arith.constant 128 : index
    %23 = vector.load %arg3[%c0_9, %c128] : memref<128x256xbf16, #tpu.memory_space<vmem>>, vector<128x128xbf16>
    %cst_10 = arith.constant dense<0.000000e+00> : vector<8x128xf32>
    %24 = tpu.matmul %22, %23, %cst_10 {dimension_numbers = #tpu.dot_dimension_numbers<[1], [0], [0], [1], [0, 0, 1, 1], [], []>} : vector<8x128xbf16>, vector<128x128xbf16>, vector<8x128xf32> -> vector<8x128xf32>
    %25 = vector.broadcast %3 : vector<1x128xf32> to vector<8x128xf32>
    %26 = arith.addf %24, %25 : vector<8x128xf32>
    %c0_11 = arith.constant 0 : index
    %c0_12 = arith.constant 0 : index
    %27 = vector.load %arg4[%c0_11, %c0_12] : memref<8x128xf32, #tpu.memory_space<vmem>>, vector<8x128xf32>
    tpu.vector_store %arg4[%c0_11, %c0_12], %26 {strides = array<i32>} : memref<8x128xf32, #tpu.memory_space<vmem>>, vector<8x128xf32>,
    return
  }
  func.func @transform_0(%arg0: i32) -> (i32, i32) {
    %c0_i32 = arith.constant 0 : i32
    %c0_i32_0 = arith.constant 0 : i32
    return %arg0, %c0_i32 : i32, i32
  }
  func.func @transform_1(%arg0: i32) -> (i32, i32) {
    %c0_i32 = arith.constant 0 : i32
    %c0_i32_0 = arith.constant 0 : i32
    %c0_i32_1 = arith.constant 0 : i32
    return %c0_i32, %c0_i32_0 : i32, i32
  }
  func.func @transform_2(%arg0: i32) -> (i32, i32) {
    %c0_i32 = arith.constant 0 : i32
    %c0_i32_0 = arith.constant 0 : i32
    %c0_i32_1 = arith.constant 0 : i32
    return %c0_i32, %c0_i32_0 : i32, i32
  }
  func.func @transform_3(%arg0: i32) -> (i32, i32) {
    %c0_i32 = arith.constant 0 : i32
    %c0_i32_0 = arith.constant 0 : i32
    return %arg0, %c0_i32 : i32, i32
  }
}

</mosaic_0001>

<bundles_post_ra>
// kernel: tpu_custom_call.1
= control target key start
LH: loop header
LB: loop body
LE: loop exit
PB: predicated region body
PF: predicated region fallthrough
CT: control target
= control target key end

     0   :  { %8 = vsyncpa [#allocation3], 0  ;;  %s657_s0 = inlined_call_operand.vmem [shape: f32[8,1], index: 0, kind: input, shape index: {}]   ;;  %s658_s1 = inlined_call_operand.vmem [shape: f32[4,128], index: 1, kind: input, shape index: {}]   ;;  %s659_s2 = inlined_call_operand.hbm [shape: bf16[128,256], index: 2, kind: input, shape index: {}]   ;;  %s660_s3 = inlined_call_operand.hbm [shape: f32[8,128], index: 3, kind: output, shape index: {}]  }
   0x1   :  { %9 = vsyncpa [#allocation4], 0  ;;  %s564_s12 = smov [#allocation2]  }
   0x2   :  { %s19_s13 = sshll.u32 %s564_s12, 4  ;;  %s20_s13 = int_to_ptr.vmem [resolvable:$true] %s19_s13 }
   0x3   :  { %s528_s14 = scalar_lea.vmem %s20_s13, 2048  ;;  %p533_p1 = scmp.lt.s32.totalorder %s20_s13, %s20_s13 }
   0x4   :  { %p529_p0 = scmp.ne.s32.totalorder %s20_s13, %s528_s14  ;;  %p534_p2 = scmp.lt.s32.totalorder %s528_s14, %s528_s14 }
   0x6   :  { %p535_p3 = por %p534_p2, %p533_p1 }
   0x8   :  { %p536_p4 = pnand %p535_p3, %p529_p0 }
   0xa   :  { %539 = shalt.err (!%p536_p4)
}
   0xb   :  { %s565_s15 = smov 128   ;;  %s566_s16 = smov 8  }
   0xc   :  { %25 = dma.hbm_to_vmem [thread:$0]  %s659_s2, 2048, %s20_s13, [#allocation3], %s565_s15, %s565_s15, %s566_s16  }
   0xd   :  { %560 = dma.done.wait [#allocation3], 2048  }
   0xe   :  { %561 = vsyncadd [#allocation3], 4294965248  ;;  %v567_v0 = vmov 0   ;;  %v34_v1 = vld [vmem:[%s657_s0] sm:$0xff]  ;;  %v496_v2 = vld [vmem:[#allocation2 + $0x70] ss:$8 sps:$4 sm:$0xff]  }
   0xf   :  { %495 = vset.pattern.permute.xlu0 %v567_v0  ;;  %v568_v3 = vmov 0.0   ;;  %v497_v4 = vld [vmem:[#allocation2 + $0x60] ss:$8 sps:$4 sm:$0xff]   ;;  %v498_v5 = vld [vmem:[#allocation2 + $0x50] ss:$8 sps:$4 sm:$0xff]   ;;  %vm569_vm0 = vmmov 0  }
  0x10   :  { %37 = vperm.xlu0 %495, %v34_v1   ;;  %438 = vmatprep.subr.bf16.mxu0 %v568_v3  ;;  %v499_v6 = vld [vmem:[#allocation2 + $0x40] ss:$8 sps:$4 sm:$0xff]   ;;  %v500_v7 = vld [vmem:[#allocation2 + $0x30] ss:$8 sps:$4 sm:$0xff]   ;;  %v570_v26 = vmov 683565275  }
  0x11   :  { %458 = vmatprep.subr.bf16.mxu1 %v568_v3  ;;  %439 = vmatpush3.bf16.msra.mxu0 %v496_v2  ;;  %v501_v8 = vld [vmem:[#allocation2 + $0x20] ss:$8 sps:$4 sm:$0xff]   ;;  %v502_v9 = vld [vmem:[#allocation2 + $0x10] ss:$8 sps:$4 sm:$0xff]   ;;  %v571_v28 = vmov 2475754826  }
  0x12   :  { %440 = vmatprep.subr.bf16.mxu0 %v568_v3  ;;  %454 = vmatprep.mubr.msk.bf16.mxu0 %vm569_vm0, %v568_v3  ;;  %v503_v10 = vld [vmem:[#allocation2] ss:$8 sps:$4 sm:$0xff]   ;;  %v572_v31 = vmov 2131351028   ;;  %v573_v34 = vmov 2102212464  }
  0x13   :  { %474 = vmatprep.mubr.msk.bf16.mxu1 %vm569_vm0, %v568_v3  ;;  %v395_v11 = vld [vmem:[%s658_s1] ss:$0 sm:$0xff]  ;;  %v396_v13 = vld [vmem:[%s658_s1 + $0x1] ss:$0 sm:$0xff]  ;;  %v574_v37 = vmov 920167782  }
  0x14   :  { %v575_v40 = vmov 1326507024   ;;  %s576_s27 = smov [#allocation5]  }
  0x15   :  { %441 = vmatpush3.bf16.msra.mxu0 %v497_v4  ;;  %s386_s28 = sshll.u32 %s576_s27, 4  ;;  %s387_s28 = int_to_ptr.vmem [resolvable:$true] %s386_s28 }
  0x16   :  { %442 = vmatprep.subr.bf16.mxu0 %v568_v3  ;;  %s540_s29 = scalar_lea.vmem %s387_s28, 128  ;;  %p545_p6 = scmp.lt.s32.totalorder %s387_s28, %s387_s28 }
  0x17   :  { %p541_p5 = scmp.ne.s32.totalorder %s387_s28, %s540_s29  ;;  %p546_p7 = scmp.lt.s32.totalorder %s540_s29, %s540_s29 }
  0x19   :  { %443 = vmatpush3.bf16.msra.mxu0 %v498_v5  ;;  %p547_p8 = por %p546_p7, %p545_p6 }
  0x1a   :  { %444 = vmatprep.subr.bf16.mxu0 %v568_v3 }
  0x1b   :  { %p548_p9 = pnand %p547_p8, %p541_p5 }
  0x1d   :  { %445 = vmatpush3.bf16.msra.mxu0 %v499_v6 }
  0x1e   :  { %446 = vmatprep.subr.bf16.mxu0 %v568_v3 }
  0x21   :  { %447 = vmatpush3.bf16.msra.mxu0 %v500_v7 }
  0x22   :  { %448 = vmatprep.subr.bf16.mxu0 %v568_v3 }
  0x25   :  { %449 = vmatpush3.bf16.msra.mxu0 %v501_v8 }
  0x26   :  { %450 = vmatprep.subr.bf16.mxu0 %v568_v3 }
  0x29   :  { %451 = vmatpush3.bf16.msra.mxu0 %v502_v9 }
  0x2a   :  { %452 = vmatprep.subr.bf16.mxu0 %v568_v3 }
  0x2d   :  { %453 = vmatpush3.bf16.msra.mxu0 %v503_v10 }
  0x8b   :  { %v38_v12 = vpop.permute.xlu0 %37 }
  0x8c   :  { %v44_v14 = vmul.f32 %v395_v11, %v38_v12 }
  0x8e   :  { %v620_v15 = vadd.f32 %v396_v13, %v44_v14 }
  0x90   :  { %v53_v16 = vand.u32 2139095040, %v620_v15  ;;  %v50_v20 = vand.u32 2147483647, %v620_v15  ;;  %vm52_vm8 = vcmp.lt.s32.totalorder %v620_v15, 0  ;;  %vm142_vm13 = vweird.f32 %v620_v15 }
  0x92   :  { %v54_v17 = vshrl.u32 %v53_v16, 23  ;;  %v57_v23 = vand.u32 8388607, %v50_v20  ;;  %vm51_vm9 = vcmp.le.f32.partialorder %v50_v20, 0.7853982 }
  0x94   :  { %v397_v18 = vadd.s32 4294967169, %v54_v17  ;;  %v58_v42 = vor.u32 8388608, %v57_v23 }
  0x96   :  { %v60_v19 = vadd.s32 1, %v397_v18  ;;  %v98_v56 = vshll.u32 %v58_v42, 8 }
  0x98   :  { %vm61_vm1 = vcmp.gt.s32.totalorder %v60_v19, 0 }
  0x99   :  { %v62_v21 = vsel %vm61_vm1, %v60_v19, 0 }
  0x9a   :  { %v64_v22 = vand.u32 31, %v62_v21  ;;  %v63_v25 = vshrl.u32 %v62_v21, 5 }
  0x9c   :  { %v65_v24 = vsub.s32 32, %v64_v22  ;;  %v67_v27 = vshll.u32 %v570_v26, %v64_v22  ;;  %v70_v29 = vshll.u32 %v571_v28, %v64_v22  ;;  %v73_v33 = vshll.u32 %v572_v31, %v64_v22 }
  0x9d   :  { %v76_v36 = vshll.u32 %v573_v34, %v64_v22  ;;  %v79_v39 = vshll.u32 %v574_v37, %v64_v22  ;;  %vm82_vm2 = vcmp.lt.s32.totalorder %v63_v25, 1  ;;  %vm85_vm3 = vcmp.lt.s32.totalorder %v63_v25, 4 }
  0x9e   :  { %v68_v30 = vshrl.u32 %v571_v28, %v65_v24  ;;  %v71_v32 = vshrl.u32 %v572_v31, %v65_v24  ;;  %v74_v35 = vshrl.u32 %v573_v34, %v65_v24  ;;  %v77_v38 = vshrl.u32 %v574_v37, %v65_v24 }
  0x9f   :  { %v80_v41 = vshrl.u32 %v575_v40, %v65_v24  ;;  %v66_v51 = vshrl.u32 %v570_v26, %v65_v24  ;;  %vm84_vm4 = vcmp.lt.s32.totalorder %v63_v25, 3  ;;  %vm83_vm5 = vcmp.lt.s32.totalorder %v63_v25, 2 }
  0xa0   :  { %v69_v43 = vor.u32 %v68_v30, %v67_v27  ;;  %v72_v44 = vor.u32 %v71_v32, %v70_v29  ;;  %v75_v45 = vor.u32 %v74_v35, %v73_v33  ;;  %v78_v46 = vor.u32 %v77_v38, %v76_v36 }
  0xa1   :  { %v81_v47 = vor.u32 %v80_v41, %v79_v39 }
  0xa2   :  { %v87_v48 = vsel %vm85_vm3, %v75_v45, 2102212464  ;;  %v90_v49 = vsel %vm82_vm2, %v69_v43, %v72_v44  ;;  %v94_v50 = vsel %vm82_vm2, %v72_v44, %v75_v45  ;;  %v91_v52 = vsel %vm85_vm3, %v78_v46, 920167782 }
  0xa3   :  { %v95_v53 = vsel %vm85_vm3, %v81_v47, 1326507024  ;;  %v92_v54 = vsel %vm84_vm4, %v75_v45, %v91_v52  ;;  %v86_v57 = vsel %vm82_vm2, %v66_v51, %v69_v43  ;;  %v88_v58 = vsel %vm84_vm4, %v72_v44, %v87_v48  ;;  %v505_v47 = vld [vmem:[#allocation2 + $0x64] ss:$8 sps:$4 sm:$0xff]   ;;  %v506_v48 = vld [vmem:[#allocation2 + $0x54] ss:$8 sps:$4 sm:$0xff]  }
  0xa4   :  { %v96_v55 = vsel %vm84_vm4, %v78_v46, %v95_v53  ;;  %v93_v59 = vsel %vm83_vm5, %v90_v49, %v92_v54  ;;  %v89_v1 = vsel %vm83_vm5, %v86_v57, %v88_v58  ;;  %v504_v46 = vld [vmem:[#allocation2 + $0x74] ss:$8 sps:$4 sm:$0xff]   ;;  %v507_v49 = vld [vmem:[#allocation2 + $0x44] ss:$8 sps:$4 sm:$0xff]   ;;  %v401_v53 = vld [vmem:[%s658_s1 + $0x2] ss:$0 sm:$0xff] }
  0xa5   :  { %v97_v60 = vsel %vm83_vm5, %v94_v50, %v96_v55  ;;  %v629_v63 = vmul.u32.u64.low %v98_v56, %v93_v59  ;;  %v630_v0 = vmul.u32.u64.high %v98_v56, %v93_v59, %v629_v63  ;;  %v105_v4 = vmul.u32 %v98_v56, %v89_v1  ;;  %459 = vmatpush3.bf16.msra.mxu1 %v504_v46  ;;  %v509_v50 = vld [vmem:[#allocation2 + $0x24] ss:$8 sps:$4 sm:$0xff]   ;;  %v510_v51 = vld [vmem:[#allocation2 + $0x14] ss:$8 sps:$4 sm:$0xff]  }
  0xa6   :  { %v626_v61 = vmul.u32.u64.low %v98_v56, %v97_v60  ;;  %v627_v62 = vmul.u32.u64.high %v98_v56, %v97_v60, %v626_v61  ;;  %460 = vmatprep.subr.bf16.mxu1 %v568_v3  ;;  %v511_v52 = vld [vmem:[#allocation2 + $0x4] ss:$8 sps:$4 sm:$0xff]  }
  0xa7   :  { %v108_v2 = vadd.s32 1, %v630_v0 }
  0xa8   :  { %vm107_vm6 = vc.u32 %v627_v62, %v629_v63  ;;  %v106_v17 = vadd.s32 %v629_v63, %v627_v62 }
  0xa9   :  { %v109_v5 = vsel %vm107_vm6, %v108_v2, %v630_v0  ;;  %461 = vmatpush3.bf16.msra.mxu1 %v505_v47 }
  0xaa   :  { %v110_v6 = vadd.s32 %v109_v5, %v105_v4  ;;  %462 = vmatprep.subr.bf16.mxu1 %v568_v3 }
  0xac   :  { %v111_v7 = vadd.s32 536870912, %v110_v6 }
  0xad   :  { %463 = vmatpush3.bf16.msra.mxu1 %v506_v48 }
  0xae   :  { %v112_v8 = vshrl.u32 %v111_v7, 30  ;;  %464 = vmatprep.subr.bf16.mxu1 %v568_v3 }
  0xb0   :  { %v113_v9 = vshll.u32 %v112_v8, 30  ;;  %v136_v31 = vsub.s32 4, %v112_v8 }
  0xb1   :  { %465 = vmatpush3.bf16.msra.mxu1 %v507_v49 }
  0xb2   :  { %v114_v10 = vsub.s32 %v110_v6, %v113_v9  ;;  %v137_v34 = vsel %vm52_vm8, %v136_v31, %v112_v8  ;;  %466 = vmatprep.subr.bf16.mxu1 %v568_v3 }
  0xb3   :  { %v139_v35 = vsel %vm51_vm9, 0, %v137_v34 }
  0xb4   :  { %v116_v11 = vsub.s32 0, %v114_v10  ;;  %v143_v36 = vadd.s32 3, %v139_v35 }
  0xb6   :  { %v398_v12 = vmin.u32 %v116_v11, %v114_v10  ;;  %v144_v37 = vand.u32 3, %v143_v36 }
  0xb8   :  { %v118_v13 = vclz %v398_v12  ;;  %vm149_vm10 = vcmp.eq.s32.totalorder %v144_v37, 2  ;;  %vm146_vm11 = vcmp.eq.s32.totalorder %v144_v37, 0  ;;  %vm145_vm12 = vcmp.lt.s32.totalorder %v144_v37, 2 }
  0xba   :  { %v399_v14 = vadd.s32 4294967294, %v118_v13 }
  0xbc   :  { %vm400_vm7 = vcmp.lt.s32.totalorder %v399_v14, 0 }
  0xbd   :  { %v121_v16 = vsel %vm400_vm7, 0, %v399_v14 }
  0xbe   :  { %v122_v18 = vsub.s32 32, %v121_v16  ;;  %v126_v19 = vsub.s32 4294967266, %v121_v16  ;;  %v123_v21 = vshll.u32 %v114_v10, %v121_v16 }
  0xc0   :  { %v124_v22 = vshrl.u32 %v106_v17, %v122_v18  ;;  %v127_v23 = vadd.s32 127, %v126_v19 }
  0xc2   :  { %v125_v24 = vor.u32 %v124_v22, %v123_v21  ;;  %v128_v25 = vshll.u32 %v127_v23, 23 }
  0xc4   :  { %v129_v26 = vor.u32 4788187, %v128_v25  ;;  %v132_v28 = vcvt.s32.f32 %v125_v24 }
  0xc6   :  { %v130_v27 = vand.u32 2147483647, %v129_v26 }
  0xc8   :  { %v133_v29 = vmul.f32 %v132_v28, %v130_v27 }
  0xca   :  { %v134_v30 = vxor.u32 2147483648, %v133_v29 }
  0xcc   :  { %v135_v32 = vsel %vm52_vm8, %v134_v30, %v133_v29 }
  0xcd   :  { %v138_v33 = vsel %vm51_vm9, %v620_v15, %v135_v32  ;;  %v508_v15 = vld [vmem:[#allocation2 + $0x34] ss:$8 sps:$4 sm:$0xff]  }
  0xce   :  { %512 = vcosq.f32 %v138_v33  ;;  %467 = vmatpush3.bf16.msra.mxu1 %v508_v15 }
  0xcf   :  { %514 = vsinq.f32 %v138_v33  ;;  %468 = vmatprep.subr.bf16.mxu1 %v568_v3 }
  0xd2   :  { %469 = vmatpush3.bf16.msra.mxu1 %v509_v50 }
  0xd3   :  { %470 = vmatprep.subr.bf16.mxu1 %v568_v3 }
  0xd6   :  { %471 = vmatpush3.bf16.msra.mxu1 %v510_v51 }
  0xd7   :  { %472 = vmatprep.subr.bf16.mxu1 %v568_v3  ;;  %v411_v3 = vld [vmem:[%s658_s1 + $0x3] ss:$0 sm:$0xff] }
  0xda   :  { %473 = vmatpush3.bf16.msra.mxu1 %v511_v52 }
  0xdb   :  { %v513_v38 = vpop.eup %512 }
  0xdc   :  { %v515_v39 = vpop.eup %514  ;;  %v150_v40 = vxor.u32 2147483648, %v513_v38 }
  0xdd   :  { %v147_v41 = vxor.u32 2147483648, %v515_v39 }
  0xde   :  { %v151_v42 = vsel %vm149_vm10, %v150_v40, %v515_v39 }
  0xdf   :  { %v148_v43 = vsel %vm146_vm11, %v513_v38, %v147_v41 }
  0xe0   :  { %v152_v20 = vsel %vm145_vm12, %v148_v43, %v151_v42 }
  0xe1   :  { %v153_v44 = vsel %vm142_vm13, nan, %v152_v20 }
  0xe2   :  { %v154_v45 = vpack.c.bf16 %v153_v44, %v153_v44 }
  0xe4   :  { %455 = vmatmul.mubr.bf16.vlgmr.msra.gmra.mxu0 %v154_v45 }
 0x1a4   :  { %v257_v54 = vpop.f32.mrf.mxu0 }
 0x1a5   :  { %v258_v55 = vadd.f32 %v401_v53, %v257_v54 }
 0x1a6   :  { %v456_v56 = vpop.f32.mrf.mxu0 }
 0x1a7   :  { %v410_v57 = vmul.f32 -1.442695, %v258_v55 }
 0x1a8   :  { %v260_v58 = vpop.f32.mrf.mxu0 }
 0x1a9   :  { %516 = vpow2.f32 %v410_v57 }
 0x1aa   :  { %v457_v59 = vpop.f32.mrf.mxu0 }
 0x1b6   :  { %v517_v60 = vpop.eup %516 }
 0x1b7   :  { %v266_v61 = vadd.f32 1.0, %v517_v60 }
 0x1b9   :  { %518 = vrcp.f32 %v266_v61 }
 0x1c6   :  { %v519_v62 = vpop.eup %518 }
 0x1c7   :  { %v269_v63 = vmul.f32 %v519_v62, %v258_v55 }
 0x1c9   :  { %v270_v0 = vpack.c.bf16 %v269_v63, %v269_v63 }
 0x1cb   :  { %475 = vmatmul.mubr.bf16.vlgmr.msra.gmra.mxu1 %v270_v0 }
 0x28b   :  { %v373_v1 = vpop.f32.mrf.mxu1 }
 0x28c   :  { %v374_v2 = vadd.f32 %v411_v3, %v373_v1 }
 0x28d   :  { %v476_v4 = vpop.f32.mrf.mxu1 }
 0x28e   :  { %379 = vst [vmem:[#allocation5] sm:$0xff] %v374_v2 }
 0x28f   :  { %v376_v5 = vpop.f32.mrf.mxu1 }
 0x290   :  { %551 = shalt.err (!%p548_p9)
}
 0x291   :  { %389 = dma.vmem_to_hbm [thread:$0]  %s387_s28, 128, %s660_s3, [#allocation4]   ;;  %v477_v6 = vpop.f32.mrf.mxu1 }
 0x292   :  { %562 = dma.done.wait [#allocation4], 128  }
 0x293   :  { %563 = vsyncadd [#allocation4], 4294967168 }
 0x294   :  { %393 = vsyncpa [#allocation3], 1 }
 0x295   :  { %394 = vsyncpa [#allocation4], 1 }

</bundles_post_ra>
